<compile_context>
chip_gen: v6e
topology: v6e:2x2x1
jax: 0.10.0
libtpu: 0.0.40
codegen_flags: <defaults>
</compile_context>

<pallas_src>
import jax
import jax.numpy as jnp
from jax.experimental import pallas as pl
from jax.experimental.pallas import tpu as pltpu


# ----------------------------------------------------------------------------
# Kernel 1: phi_prob = sigmoid(phi), computed/stored exactly once.
# ----------------------------------------------------------------------------
def sigmoid_kernel(phi_ref, out_ref):
    x = phi_ref[...]                                            # (K, D, T)
    out_ref[...] = pl.reciprocal(1.0 + jnp.exp(-x), approx=True).astype(
        out_ref.dtype)


# ----------------------------------------------------------------------------
# Kernel 2: per-N-tile softmax over K + VPU contraction over K.
#   lam_ref  : (NB, K, T)  lambda tile
#   phip_ref : (K,  D, T)  full phi_prob (resident across the N grid axis)
#   theta_ref: (NB, K, T)
#   pi_ref   : (NB, D, T)
# ----------------------------------------------------------------------------
def theta_pi_kernel(lam_ref, phip_ref, theta_ref, pi_ref):
    lam = lam_ref[...]                                          # (NB, K, T)
    K = lam.shape[1]

    # softmax over K: sublane-axis reduction, T stays dense in lanes.
    m = jnp.max(lam, axis=1, keepdims=True)                     # (NB, 1, T)
    e = jnp.exp(lam - m)                                        # (NB, K, T)
    s = jnp.sum(e, axis=1, keepdims=True)                       # (NB, 1, T)
    theta = e * pl.reciprocal(s, approx=True)                   # (NB, K, T)
    theta_ref[...] = theta.astype(theta_ref.dtype)

    phip = phip_ref[...]                                        # (K, D, T)

    # pi[n,d,t] = sum_k theta[n,k,t] * phi_prob[k,d,t]
    # K is tiny -> unrolled VPU multiply-add (no MXU on the critical path).
    acc = theta[:, 0, :][:, None, :] * phip[0][None, :, :]      # (NB, D, T)
    for k in range(1, K):
        acc = acc + theta[:, k, :][:, None, :] * phip[k][None, :, :]
    pi_ref[...] = acc.astype(pi_ref.dtype)


# ----------------------------------------------------------------------------
# Wrapper
# ----------------------------------------------------------------------------
def _num_n_tiles(N):
    """>= 2 parallel N tiles when possible (v7x has 2 TensorCores per chip);
    keep per-tile row count bounded for large N."""
    if N >= 2 and N % 2 == 0:
        tiles = 2
        while (N // tiles) > 512 and N % (tiles * 2) == 0:
            tiles *= 2
        return tiles
    return 1


def aladyn_forward(lambda_, phi):
    """Pallas implementation of AladynSurvivalModel.forward().

    Args:
      lambda_: (N, K, T) float32
      phi:     (K, D, T) float32
    Returns:
      pi (N, D, T), theta (N, K, T), phi_prob (K, D, T)  -- all float32
    """
    N, K, T = lambda_.shape
    K2, D, T2 = phi.shape
    assert K2 == K and T2 == T

    lambda_ = lambda_.astype(jnp.float32)
    phi = phi.astype(jnp.float32)

    # --- phi_prob = sigmoid(phi): single-block kernel, computed once --------
    phi_prob = pl.pallas_call(
        sigmoid_kernel,
        out_shape=jax.ShapeDtypeStruct((K, D, T), jnp.float32),
        grid=(1,),
        in_specs=[pl.BlockSpec((K, D, T), lambda i: (0, 0, 0))],
        out_specs=pl.BlockSpec((K, D, T), lambda i: (0, 0, 0)),
    )(phi)

    # --- theta + pi: grid over N tiles, parallel (megacore on v7x) ----------
    n_tiles = _num_n_tiles(N)
    NB = N // n_tiles

    theta, pi = pl.pallas_call(
        theta_pi_kernel,
        out_shape=(
            jax.ShapeDtypeStruct((N, K, T), jnp.float32),   # theta
            jax.ShapeDtypeStruct((N, D, T), jnp.float32),   # pi
        ),
        grid=(n_tiles,),
        in_specs=[
            pl.BlockSpec((NB, K, T), lambda i: (i, 0, 0)),   # lambda tile
            pl.BlockSpec((K, D, T), lambda i: (0, 0, 0)),    # full phi_prob
        ],
        out_specs=(
            pl.BlockSpec((NB, K, T), lambda i: (i, 0, 0)),
            pl.BlockSpec((NB, D, T), lambda i: (i, 0, 0)),
        ),
        compiler_params=pltpu.CompilerParams(
            dimension_semantics=("parallel",)),
    )(lambda_, phi_prob)

    return pi, theta, phi_prob


# ----------------------------------------------------------------------------
# Deterministic parameter initialization (mirrors __init__ / initialize_params
# shapes; SVD-based means + GP-correlated noise around them).
# ----------------------------------------------------------------------------
def init_params(key, N, D, T, K, P):
    kG, kY, kprev, klam, kphi = jax.random.split(key, 5)

    G = jax.random.normal(kG, (N, P), dtype=jnp.float32)
    Y = (jax.random.uniform(kY, (N, D, T)) < 0.2).astype(jnp.float32)
    prevalence = jax.random.uniform(kprev, (D,), minval=0.05, maxval=0.3)
    logit_prev = jnp.log(prevalence / (1.0 - prevalence))

    # SVD init for factor means (as in initialize_params)
    Y_avg = jnp.mean(Y, axis=2)                                # (N, D)
    U, S, _ = jnp.linalg.svd(Y_avg, full_matrices=False)
    lambda_init = U[:, :K] @ jnp.diag(jnp.sqrt(S[:K]))         # (N, K)
    gamma = jnp.linalg.lstsq(G, lambda_init)[0]                # (P, K)
    lambda_means = G @ gamma                                   # (N, K)

    # GP-correlated noise (RBF kernel, length_scale = T/3, amplitude = 1)
    times = jnp.arange(T, dtype=jnp.float32)
    sq_dists = (times[None, :] - times[:, None]) ** 2
    ls = T / 3.0
    Kmat = jnp.exp(-0.5 * sq_dists / ls**2) + 1e-4 * jnp.eye(T, dtype=jnp.float32)
    L = jnp.linalg.cholesky(Kmat)                              # (T, T)

    eps_lam = jax.random.normal(klam, (N, K, T), dtype=jnp.float32)
    eps_phi = jax.random.normal(kphi, (K, D, T), dtype=jnp.float32)
    lambda_ = lambda_means[:, :, None] + jnp.einsum('ts,nks->nkt', L, eps_lam)
    phi = logit_prev[None, :, None] + jnp.einsum('ts,kds->kdt', L, eps_phi)
    return lambda_.astype(jnp.float32), phi.astype(jnp.float32)


# ----------------------------------------------------------------------------
# Pure-JAX reference of the PyTorch forward (for correctness check)
# ----------------------------------------------------------------------------
def forward_ref(lambda_, phi):
    theta = jax.nn.softmax(lambda_, axis=1)
    phi_prob = jax.nn.sigmoid(phi)
    pi = jnp.einsum('nkt,kdt->ndt', theta, phi_prob)
    return pi, theta, phi_prob


if __name__ == "__main__":
    # Small shapes consistent with the module's forward
    N, D, T, K, P = 16, 32, 8, 4, 4

    key = jax.random.PRNGKey(0)
    lambda_, phi = init_params(key, N, D, T, K, P)

    fwd = jax.jit(aladyn_forward)
    pi, theta, phi_prob = fwd(lambda_, phi)
    jax.block_until_ready((pi, theta, phi_prob))

    pi_r, theta_r, phip_r = forward_ref(lambda_, phi)
    assert pi.shape == (N, D, T)
    assert theta.shape == (N, K, T)
    assert phi_prob.shape == (K, D, T)
    # Tolerance relaxed from 1e-5 because of pl.reciprocal(approx=True)
    # (EUP approximate reciprocal), per the performance review's note.
    assert jnp.allclose(pi, pi_r, atol=2e-3, rtol=2e-3)
    assert jnp.allclose(theta, theta_r, atol=2e-3, rtol=2e-3)
    assert jnp.allclose(phi_prob, phip_r, atol=2e-3, rtol=2e-3)

    print("KERNEL_OK")
</pallas_src>

<mosaic_0001>
module attributes {stable_mosaic.version = 11 : i64} {
  func.func @sigmoid_kernel(%arg0: i32, %arg1: memref<4x32x8xf32, #tpu.memory_space<vmem>>, %arg2: memref<4x32x8xf32, #tpu.memory_space<vmem>>) attributes {dimension_semantics = [#tpu.dimension_semantics<arbitrary>], iteration_bounds = array<i64: 1>, scalar_prefetch = 0 : i64, scratch_operands = 0 : i64, tpu.core_type = #tpu.core_type<tc>, window_params = [{pipeline_mode = #tpu.pipeline_mode<synchronous>, transform_indices = @transform_0, window_bounds = array<i64: 4, 32, 8>}, {pipeline_mode = #tpu.pipeline_mode<synchronous>, transform_indices = @transform_1, window_bounds = array<i64: 4, 32, 8>}]} {
    %c0 = arith.constant 0 : index
    %c0_0 = arith.constant 0 : index
    %c0_1 = arith.constant 0 : index
    %0 = vector.load %arg1[%c0, %c0_0, %c0_1] : memref<4x32x8xf32, #tpu.memory_space<vmem>>, vector<4x32x8xf32>
    %cst = arith.constant 0.000000e+00 : f32
    %1 = vector.broadcast %cst : f32 to vector<4x32x8xf32>
    %2 = arith.subf %1, %0 : vector<4x32x8xf32>
    %3 = math.exp %2 : vector<4x32x8xf32>
    %cst_2 = arith.constant 1.000000e+00 : f32
    %4 = vector.broadcast %cst_2 : f32 to vector<4x32x8xf32>
    %5 = arith.addf %4, %3 : vector<4x32x8xf32>
    %6 = tpu.reciprocal %5 {approx = true} : vector<4x32x8xf32> -> vector<4x32x8xf32>
    %c0_3 = arith.constant 0 : index
    %c0_4 = arith.constant 0 : index
    %c0_5 = arith.constant 0 : index
    %7 = vector.load %arg2[%c0_3, %c0_4, %c0_5] : memref<4x32x8xf32, #tpu.memory_space<vmem>>, vector<4x32x8xf32>
    tpu.vector_store %arg2[%c0_3, %c0_4, %c0_5], %6 {strides = array<i32>} : memref<4x32x8xf32, #tpu.memory_space<vmem>>, vector<4x32x8xf32>,
    return
  }
  func.func @transform_0(%arg0: i32) -> (i32, i32, i32) {
    %c0_i32 = arith.constant 0 : i32
    %c0_i32_0 = arith.constant 0 : i32
    %c0_i32_1 = arith.constant 0 : i32
    %c0_i32_2 = arith.constant 0 : i32
    return %c0_i32, %c0_i32_0, %c0_i32_1 : i32, i32, i32
  }
  func.func @transform_1(%arg0: i32) -> (i32, i32, i32) {
    %c0_i32 = arith.constant 0 : i32
    %c0_i32_0 = arith.constant 0 : i32
    %c0_i32_1 = arith.constant 0 : i32
    %c0_i32_2 = arith.constant 0 : i32
    return %c0_i32, %c0_i32_0, %c0_i32_1 : i32, i32, i32
  }
}

module attributes {stable_mosaic.version = 11 : i64} {
  func.func @theta_pi_kernel(%arg0: i32, %arg1: memref<8x4x8xf32, #tpu.memory_space<vmem>>, %arg2: memref<4x32x8xf32, #tpu.memory_space<vmem>>, %arg3: memref<8x4x8xf32, #tpu.memory_space<vmem>>, %arg4: memref<8x32x8xf32, #tpu.memory_space<vmem>>) attributes {dimension_semantics = [#tpu.dimension_semantics<parallel>], iteration_bounds = array<i64: 2>, scalar_prefetch = 0 : i64, scratch_operands = 0 : i64, tpu.core_type = #tpu.core_type<tc>, window_params = [{transform_indices = @transform_0, window_bounds = array<i64: 8, 4, 8>}, {pipeline_mode = #tpu.pipeline_mode<synchronous>, transform_indices = @transform_1, window_bounds = array<i64: 4, 32, 8>}, {transform_indices = @transform_2, window_bounds = array<i64: 8, 4, 8>}, {transform_indices = @transform_3, window_bounds = array<i64: 8, 32, 8>}]} {
    %c0 = arith.constant 0 : index
    %c0_0 = arith.constant 0 : index
    %c0_1 = arith.constant 0 : index
    %0 = vector.load %arg1[%c0, %c0_0, %c0_1] : memref<8x4x8xf32, #tpu.memory_space<vmem>>, vector<8x4x8xf32>
    %cst = arith.constant dense<0xFF800000> : vector<8x8xf32>
    %1 = vector.multi_reduction <maximumf>, %0, %cst [1] : vector<8x4x8xf32> to vector<8x8xf32>
    %2 = vector.shape_cast %1 : vector<8x8xf32> to vector<8x1x8xf32>
    %3 = vector.broadcast %2 : vector<8x1x8xf32> to vector<8x4x8xf32>
    %4 = arith.subf %0, %3 : vector<8x4x8xf32>
    %5 = math.exp %4 : vector<8x4x8xf32>
    %cst_2 = arith.constant dense<0.000000e+00> : vector<8x8xf32>
    %6 = vector.multi_reduction <add>, %5, %cst_2 [1] : vector<8x4x8xf32> to vector<8x8xf32>
    %7 = vector.shape_cast %6 : vector<8x8xf32> to vector<8x1x8xf32>
    %8 = tpu.reciprocal %7 {approx = true} : vector<8x1x8xf32> -> vector<8x1x8xf32>
    %9 = vector.broadcast %8 : vector<8x1x8xf32> to vector<8x4x8xf32>
    %10 = arith.mulf %5, %9 : vector<8x4x8xf32>
    %c0_3 = arith.constant 0 : index
    %c0_4 = arith.constant 0 : index
    %c0_5 = arith.constant 0 : index
    %11 = vector.load %arg3[%c0_3, %c0_4, %c0_5] : memref<8x4x8xf32, #tpu.memory_space<vmem>>, vector<8x4x8xf32>
    tpu.vector_store %arg3[%c0_3, %c0_4, %c0_5], %10 {strides = array<i32>} : memref<8x4x8xf32, #tpu.memory_space<vmem>>, vector<8x4x8xf32>,
    %c0_6 = arith.constant 0 : index
    %c0_7 = arith.constant 0 : index
    %c0_8 = arith.constant 0 : index
    %12 = vector.load %arg2[%c0_6, %c0_7, %c0_8] : memref<4x32x8xf32, #tpu.memory_space<vmem>>, vector<4x32x8xf32>
    %13 = vector.extract_strided_slice %10 {offsets = [0, 0, 0], sizes = [8, 1, 8], strides = [1, 1, 1]} : vector<8x4x8xf32> to vector<8x1x8xf32>
    %14 = vector.shape_cast %13 : vector<8x1x8xf32> to vector<8x8xf32>
    %15 = vector.shape_cast %14 : vector<8x8xf32> to vector<8x1x8xf32>
    %16 = vector.extract_strided_slice %12 {offsets = [0, 0, 0], sizes = [1, 32, 8], strides = [1, 1, 1]} : vector<4x32x8xf32> to vector<1x32x8xf32>
    %17 = vector.shape_cast %16 : vector<1x32x8xf32> to vector<32x8xf32>
    %18 = vector.shape_cast %17 : vector<32x8xf32> to vector<1x32x8xf32>
    %19 = vector.broadcast %15 : vector<8x1x8xf32> to vector<8x32x8xf32>
    %20 = vector.broadcast %18 : vector<1x32x8xf32> to vector<8x32x8xf32>
    %21 = arith.mulf %19, %20 : vector<8x32x8xf32>
    %22 = vector.extract_strided_slice %10 {offsets = [0, 1, 0], sizes = [8, 1, 8], strides = [1, 1, 1]} : vector<8x4x8xf32> to vector<8x1x8xf32>
    %23 = vector.shape_cast %22 : vector<8x1x8xf32> to vector<8x8xf32>
    %24 = vector.shape_cast %23 : vector<8x8xf32> to vector<8x1x8xf32>
    %25 = vector.extract_strided_slice %12 {offsets = [1, 0, 0], sizes = [1, 32, 8], strides = [1, 1, 1]} : vector<4x32x8xf32> to vector<1x32x8xf32>
    %26 = vector.shape_cast %25 : vector<1x32x8xf32> to vector<32x8xf32>
    %27 = vector.shape_cast %26 : vector<32x8xf32> to vector<1x32x8xf32>
    %28 = vector.broadcast %24 : vector<8x1x8xf32> to vector<8x32x8xf32>
    %29 = vector.broadcast %27 : vector<1x32x8xf32> to vector<8x32x8xf32>
    %30 = arith.mulf %28, %29 : vector<8x32x8xf32>
    %31 = arith.addf %21, %30 : vector<8x32x8xf32>
    %32 = vector.extract_strided_slice %10 {offsets = [0, 2, 0], sizes = [8, 1, 8], strides = [1, 1, 1]} : vector<8x4x8xf32> to vector<8x1x8xf32>
    %33 = vector.shape_cast %32 : vector<8x1x8xf32> to vector<8x8xf32>
    %34 = vector.shape_cast %33 : vector<8x8xf32> to vector<8x1x8xf32>
    %35 = vector.extract_strided_slice %12 {offsets = [2, 0, 0], sizes = [1, 32, 8], strides = [1, 1, 1]} : vector<4x32x8xf32> to vector<1x32x8xf32>
    %36 = vector.shape_cast %35 : vector<1x32x8xf32> to vector<32x8xf32>
    %37 = vector.shape_cast %36 : vector<32x8xf32> to vector<1x32x8xf32>
    %38 = vector.broadcast %34 : vector<8x1x8xf32> to vector<8x32x8xf32>
    %39 = vector.broadcast %37 : vector<1x32x8xf32> to vector<8x32x8xf32>
    %40 = arith.mulf %38, %39 : vector<8x32x8xf32>
    %41 = arith.addf %31, %40 : vector<8x32x8xf32>
    %42 = vector.extract_strided_slice %10 {offsets = [0, 3, 0], sizes = [8, 1, 8], strides = [1, 1, 1]} : vector<8x4x8xf32> to vector<8x1x8xf32>
    %43 = vector.shape_cast %42 : vector<8x1x8xf32> to vector<8x8xf32>
    %44 = vector.shape_cast %43 : vector<8x8xf32> to vector<8x1x8xf32>
    %45 = vector.extract_strided_slice %12 {offsets = [3, 0, 0], sizes = [1, 32, 8], strides = [1, 1, 1]} : vector<4x32x8xf32> to vector<1x32x8xf32>
    %46 = vector.shape_cast %45 : vector<1x32x8xf32> to vector<32x8xf32>
    %47 = vector.shape_cast %46 : vector<32x8xf32> to vector<1x32x8xf32>
    %48 = vector.broadcast %44 : vector<8x1x8xf32> to vector<8x32x8xf32>
    %49 = vector.broadcast %47 : vector<1x32x8xf32> to vector<8x32x8xf32>
    %50 = arith.mulf %48, %49 : vector<8x32x8xf32>
    %51 = arith.addf %41, %50 : vector<8x32x8xf32>
    %c0_9 = arith.constant 0 : index
    %c0_10 = arith.constant 0 : index
    %c0_11 = arith.constant 0 : index
    %52 = vector.load %arg4[%c0_9, %c0_10, %c0_11] : memref<8x32x8xf32, #tpu.memory_space<vmem>>, vector<8x32x8xf32>
    tpu.vector_store %arg4[%c0_9, %c0_10, %c0_11], %51 {strides = array<i32>} : memref<8x32x8xf32, #tpu.memory_space<vmem>>, vector<8x32x8xf32>,
    return
  }
  func.func @transform_0(%arg0: i32) -> (i32, i32, i32) {
    %c0_i32 = arith.constant 0 : i32
    %c0_i32_0 = arith.constant 0 : i32
    %c0_i32_1 = arith.constant 0 : i32
    return %arg0, %c0_i32, %c0_i32_0 : i32, i32, i32
  }
  func.func @transform_1(%arg0: i32) -> (i32, i32, i32) {
    %c0_i32 = arith.constant 0 : i32
    %c0_i32_0 = arith.constant 0 : i32
    %c0_i32_1 = arith.constant 0 : i32
    %c0_i32_2 = arith.constant 0 : i32
    return %c0_i32, %c0_i32_0, %c0_i32_1 : i32, i32, i32
  }
  func.func @transform_2(%arg0: i32) -> (i32, i32, i32) {
    %c0_i32 = arith.constant 0 : i32
    %c0_i32_0 = arith.constant 0 : i32
    %c0_i32_1 = arith.constant 0 : i32
    return %arg0, %c0_i32, %c0_i32_0 : i32, i32, i32
  }
  func.func @transform_3(%arg0: i32) -> (i32, i32, i32) {
    %c0_i32 = arith.constant 0 : i32
    %c0_i32_0 = arith.constant 0 : i32
    %c0_i32_1 = arith.constant 0 : i32
    return %arg0, %c0_i32, %c0_i32_0 : i32, i32, i32
  }
}

</mosaic_0001>

<bundles_post_ra>
// kernel: aladyn_forward.2
= control target key start
LH: loop header
LB: loop body
LE: loop exit
PB: predicated region body
PF: predicated region fallthrough
CT: control target
= control target key end

     0   :  { %vm104_vm0 = vcmask 64512   ;;  %s311_s0 = inlined_call_operand.vmem [shape: f32[4,32,8], index: 0, kind: input, shape index: {}]   ;;  %s312_s1 = inlined_call_operand.vmem [shape: f32[4,32,8], index: 1, kind: output, shape index: {}]  }
   0x1   :  { %v8_v0 = vld [vmem:[%s311_s0] sm:$0xff]  ;;  %v9_v1 = vld [vmem:[%s311_s0 + $0x8] sm:$0xff]  ;;  %v10_v2 = vld [vmem:[%s311_s0 + $0x10] sm:$0xff] }
   0x2   :  { %v24_v3 = vsub.f32 0.0, %v8_v0  ;;  %v25_v4 = vsub.f32 0.0, %v9_v1  ;;  %v26_v5 = vsub.f32 0.0, %v10_v2  ;;  %v11_v6 = vld [vmem:[%s311_s0 + $0x18] sm:$0xff]  ;;  %v12_v7 = vld [vmem:[%s311_s0 + $0x20] sm:$0xff]  ;;  %v13_v8 = vld [vmem:[%s311_s0 + $0x28] sm:$0xff] }
   0x3   :  { %v27_v9 = vsub.f32 0.0, %v11_v6  ;;  %v28_v10 = vsub.f32 0.0, %v12_v7  ;;  %v29_v11 = vsub.f32 0.0, %v13_v8  ;;  %v14_v12 = vld [vmem:[%s311_s0 + $0x30] sm:$0xff]  ;;  %v15_v13 = vld [vmem:[%s311_s0 + $0x38] sm:$0xff]  ;;  %v16_v14 = vld [vmem:[%s311_s0 + $0x40] sm:$0xff] }
   0x4   :  { %v40_v15 = vmul.f32 1.442695, %v24_v3  ;;  %v42_v16 = vmul.f32 1.442695, %v25_v4  ;;  %v44_v17 = vmul.f32 1.442695, %v26_v5 }
   0x5   :  { %v46_v18 = vmul.f32 1.442695, %v27_v9  ;;  %v48_v19 = vmul.f32 1.442695, %v28_v10  ;;  %v30_v20 = vsub.f32 0.0, %v14_v12  ;;  %v31_v21 = vsub.f32 0.0, %v15_v13 }
   0x6   :  { %125 = vpow2.f32 %v40_v15  ;;  %v32_v22 = vsub.f32 0.0, %v16_v14  ;;  %v17_v23 = vld [vmem:[%s311_s0 + $0x48] sm:$0xff]  ;;  %v18_v24 = vld [vmem:[%s311_s0 + $0x50] sm:$0xff]  ;;  %v19_v25 = vld [vmem:[%s311_s0 + $0x58] sm:$0xff]  ;;  %v50_v26 = vmul.f32 1.442695, %v29_v11 }
   0x7   :  { %127 = vpow2.f32 %v42_v16  ;;  %v33_v27 = vsub.f32 0.0, %v17_v23  ;;  %v20_v28 = vld [vmem:[%s311_s0 + $0x60] sm:$0xff]  ;;  %v52_v29 = vmul.f32 1.442695, %v30_v20  ;;  %v34_v30 = vsub.f32 0.0, %v18_v24  ;;  %v21_v31 = vld [vmem:[%s311_s0 + $0x68] sm:$0xff] }
   0x8   :  { %129 = vpow2.f32 %v44_v17  ;;  %v54_v32 = vmul.f32 1.442695, %v31_v21  ;;  %v35_v33 = vsub.f32 0.0, %v19_v25  ;;  %v22_v34 = vld [vmem:[%s311_s0 + $0x70] sm:$0xff]  ;;  %v56_v35 = vmul.f32 1.442695, %v32_v22 }
   0x9   :  { %131 = vpow2.f32 %v46_v18  ;;  %v36_v36 = vsub.f32 0.0, %v20_v28  ;;  %v23_v37 = vld [vmem:[%s311_s0 + $0x78] sm:$0xff]  ;;  %v58_v38 = vmul.f32 1.442695, %v33_v27  ;;  %v37_v39 = vsub.f32 0.0, %v21_v31 }
   0xa   :  { %133 = vpow2.f32 %v48_v19  ;;  %v60_v40 = vmul.f32 1.442695, %v34_v30  ;;  %v38_v41 = vsub.f32 0.0, %v22_v34  ;;  %v62_v42 = vmul.f32 1.442695, %v35_v33 }
   0xb   :  { %135 = vpow2.f32 %v50_v26  ;;  %v39_v43 = vsub.f32 0.0, %v23_v37  ;;  %v64_v44 = vmul.f32 1.442695, %v36_v36  ;;  %v66_v45 = vmul.f32 1.442695, %v37_v39 }
   0xc   :  { %137 = vpow2.f32 %v52_v29  ;;  %v68_v46 = vmul.f32 1.442695, %v38_v41 }
   0xd   :  { %139 = vpow2.f32 %v54_v32  ;;  %v70_v47 = vmul.f32 1.442695, %v39_v43 }
   0xe   :  { %141 = vpow2.f32 %v56_v35 }
   0xf   :  { %143 = vpow2.f32 %v58_v38 }
  0x10   :  { %145 = vpow2.f32 %v60_v40 }
  0x11   :  { %147 = vpow2.f32 %v62_v42 }
  0x12   :  { %149 = vpow2.f32 %v64_v44 }
  0x13   :  { %v126_v48 = vpop.eup %125  ;;  %151 = vpow2.f32 %v66_v45 }
  0x14   :  { %v128_v49 = vpop.eup %127  ;;  %v72_v50 = vadd.f32 1.0, %v126_v48  ;;  %153 = vpow2.f32 %v68_v46 }
  0x15   :  { %v130_v51 = vpop.eup %129  ;;  %v73_v52 = vadd.f32 1.0, %v128_v49  ;;  %155 = vpow2.f32 %v70_v47 }
  0x16   :  { %v132_v53 = vpop.eup %131  ;;  %157 = vrcp.f32 %v72_v50  ;;  %v74_v54 = vadd.f32 1.0, %v130_v51 }
  0x17   :  { %v134_v55 = vpop.eup %133  ;;  %159 = vrcp.f32 %v73_v52  ;;  %v75_v56 = vadd.f32 1.0, %v132_v53 }
  0x18   :  { %v136_v57 = vpop.eup %135  ;;  %161 = vrcp.f32 %v74_v54  ;;  %v76_v58 = vadd.f32 1.0, %v134_v55 }
  0x19   :  { %v138_v59 = vpop.eup %137  ;;  %163 = vrcp.f32 %v75_v56  ;;  %v77_v60 = vadd.f32 1.0, %v136_v57 }
  0x1a   :  { %v140_v61 = vpop.eup %139  ;;  %165 = vrcp.f32 %v76_v58  ;;  %v78_v62 = vadd.f32 1.0, %v138_v59 }
  0x1b   :  { %v142_v63 = vpop.eup %141  ;;  %167 = vrcp.f32 %v77_v60  ;;  %v79_v0 = vadd.f32 1.0, %v140_v61 }
  0x1c   :  { %v144_v1 = vpop.eup %143  ;;  %169 = vrcp.f32 %v78_v62  ;;  %v80_v2 = vadd.f32 1.0, %v142_v63 }
  0x1d   :  { %v146_v3 = vpop.eup %145  ;;  %171 = vrcp.f32 %v79_v0  ;;  %v81_v4 = vadd.f32 1.0, %v144_v1 }
  0x1e   :  { %v148_v5 = vpop.eup %147  ;;  %173 = vrcp.f32 %v80_v2  ;;  %v82_v6 = vadd.f32 1.0, %v146_v3 }
  0x1f   :  { %v150_v7 = vpop.eup %149  ;;  %175 = vrcp.f32 %v81_v4  ;;  %v83_v8 = vadd.f32 1.0, %v148_v5 }
  0x20   :  { %v152_v9 = vpop.eup %151  ;;  %177 = vrcp.f32 %v82_v6  ;;  %v84_v10 = vadd.f32 1.0, %v150_v7 }
  0x21   :  { %v154_v11 = vpop.eup %153  ;;  %179 = vrcp.f32 %v83_v8  ;;  %v85_v12 = vadd.f32 1.0, %v152_v9 }
  0x22   :  { %v156_v13 = vpop.eup %155  ;;  %181 = vrcp.f32 %v84_v10  ;;  %v86_v14 = vadd.f32 1.0, %v154_v11 }
  0x23   :  { %v158_v15 = vpop.eup %157  ;;  %183 = vrcp.f32 %v85_v12  ;;  %v87_v16 = vadd.f32 1.0, %v156_v13 }
  0x24   :  { %v160_v17 = vpop.eup %159  ;;  %105 = vst.msk [vmem:[%s312_s1] sm:$0xff] %vm104_vm0, %v158_v15  ;;  %185 = vrcp.f32 %v86_v14 }
  0x25   :  { %v162_v18 = vpop.eup %161  ;;  %106 = vst.msk [vmem:[%s312_s1 + $0x8] sm:$0xff] %vm104_vm0, %v160_v17  ;;  %187 = vrcp.f32 %v87_v16 }
  0x26   :  { %v164_v19 = vpop.eup %163  ;;  %107 = vst.msk [vmem:[%s312_s1 + $0x10] sm:$0xff] %vm104_vm0, %v162_v18 }
  0x27   :  { %v166_v20 = vpop.eup %165  ;;  %108 = vst.msk [vmem:[%s312_s1 + $0x18] sm:$0xff] %vm104_vm0, %v164_v19 }
  0x28   :  { %v168_v21 = vpop.eup %167  ;;  %109 = vst.msk [vmem:[%s312_s1 + $0x20] sm:$0xff] %vm104_vm0, %v166_v20 }
  0x29   :  { %v170_v22 = vpop.eup %169  ;;  %110 = vst.msk [vmem:[%s312_s1 + $0x28] sm:$0xff] %vm104_vm0, %v168_v21 }
  0x2a   :  { %v172_v23 = vpop.eup %171  ;;  %111 = vst.msk [vmem:[%s312_s1 + $0x30] sm:$0xff] %vm104_vm0, %v170_v22 }
  0x2b   :  { %v174_v24 = vpop.eup %173  ;;  %112 = vst.msk [vmem:[%s312_s1 + $0x38] sm:$0xff] %vm104_vm0, %v172_v23 }
  0x2c   :  { %v176_v25 = vpop.eup %175  ;;  %113 = vst.msk [vmem:[%s312_s1 + $0x40] sm:$0xff] %vm104_vm0, %v174_v24 }
  0x2d   :  { %v178_v26 = vpop.eup %177  ;;  %114 = vst.msk [vmem:[%s312_s1 + $0x48] sm:$0xff] %vm104_vm0, %v176_v25 }
  0x2e   :  { %v180_v27 = vpop.eup %179  ;;  %115 = vst.msk [vmem:[%s312_s1 + $0x50] sm:$0xff] %vm104_vm0, %v178_v26 }
  0x2f   :  { %v182_v28 = vpop.eup %181  ;;  %116 = vst.msk [vmem:[%s312_s1 + $0x58] sm:$0xff] %vm104_vm0, %v180_v27 }
  0x30   :  { %v184_v29 = vpop.eup %183  ;;  %117 = vst.msk [vmem:[%s312_s1 + $0x60] sm:$0xff] %vm104_vm0, %v182_v28 }
  0x31   :  { %v186_v30 = vpop.eup %185  ;;  %118 = vst.msk [vmem:[%s312_s1 + $0x68] sm:$0xff] %vm104_vm0, %v184_v29 }
  0x32   :  { %v188_v31 = vpop.eup %187  ;;  %119 = vst.msk [vmem:[%s312_s1 + $0x70] sm:$0xff] %vm104_vm0, %v186_v30 }
  0x33   :  { %120 = vst.msk [vmem:[%s312_s1 + $0x78] sm:$0xff] %vm104_vm0, %v188_v31 }

// kernel: aladyn_forward.3
= control target key start
LH: loop header
LB: loop body
LE: loop exit
PB: predicated region body
PF: predicated region fallthrough
CT: control target
= control target key end

     0   :  { %s935_s12 = smov 0   ;;  %s1436_s0 = inlined_call_operand.vmem [shape: f32[16,4,8], index: 0, kind: input, shape index: {}]   ;;  %s1437_s1 = inlined_call_operand.vmem [shape: f32[4,32,8], index: 1, kind: input, shape index: {}]   ;;  %s1438_s2 = inlined_call_operand.vmem [shape: f32[16,4,8], index: 2, kind: output, shape index: {0}]   ;;  %s1439_s3 = inlined_call_operand.vmem [shape: f32[16,32,8], index: 3, kind: output, shape index: {1}]  }
   0x1 LB: > { %s852_s13 = sadd.s32 4294967295, %s913_s12   ;;  %p856_p0 = scmp.ge.s32.totalorder %s913_s12, 1  ;;  %s913_s12 = sphi %s935_s12, %s14_s12  }
   0x2   : > { %p141_p1 = scmp.lt.s32.totalorder %s913_s12, 3 }
   0x4   : > { %p142_p2 = pnand %p856_p0, %p141_p1 }
   0x5   : > { %s857_s14 = sshll.u32 (!%p142_p2), %s852_s13, 3 }
   0x6   : > { %145 = sbr.rel (%p142_p2) target bundleno = 146 (0x92), region = 28  ;;  %p172_p3 = scmp.lt.s32.totalorder (!%p142_p2), %s857_s14, 15 }
   0xb   : > { %s1441_s14 = smov (!%p172_p3, %s857_s14), 15  ;;  %vm198_vm0 = vcmask 60416   ;;  %vm727_vm1 = vcmask 64512  }
   0xc   : > { %s858_s15 = sshll.u32 %s1441_s14, 2  ;;  %s866_s26 = sshll.u32 %s1441_s14, 5 }
   0xd   : > { %s175_s18 = scalar_lea.vmem %s1436_s0, %s858_s15  ;;  %s1034_s21 = scalar_lea.vmem %s1438_s2, %s858_s15 }
   0xe   : > { %v951_v0 = vld [vmem:[%s175_s18] sm:$0xf]  ;;  %v953_v1 = vld [vmem:[%s175_s18 + $0x4] sm:$0xf]  ;;  %v955_v2 = vld [vmem:[%s175_s18 + $0x8] sm:$0xf]  ;;  %s1187_s5 = scalar_lea.vmem %s1439_s3, %s866_s26 }
   0xf   : > { %v199_v3 = vsel %vm198_vm0, %v951_v0, -inf  ;;  %v206_v4 = vsel %vm198_vm0, %v953_v1, -inf  ;;  %v213_v5 = vsel %vm198_vm0, %v955_v2, -inf  ;;  %v963_v6 = vld [vmem:[%s175_s18 + $0xc] sm:$0xf] }
  0x10   : > { %v200_v7 = vrot.slane %v199_v3, 4  ;;  %v207_v8 = vrot.slane %v206_v4, 4  ;;  %v214_v9 = vrot.slane %v213_v5, 4  ;;  %v220_v10 = vsel %vm198_vm0, %v963_v6, -inf  ;;  %v967_v11 = vld [vmem:[%s175_s18 + $0x10] sm:$0xf] }
  0x11   : > { %v221_v12 = vrot.slane %v220_v10, 4  ;;  %v227_v13 = vsel %vm198_vm0, %v967_v11, -inf  ;;  %v971_v14 = vld [vmem:[%s175_s18 + $0x14] sm:$0xf]  ;;  %v973_v15 = vld [vmem:[%s175_s18 + $0x18] sm:$0xf] }
  0x12   : > { %v201_v16 = vmax.f32 %v199_v3, %v200_v7  ;;  %v208_v17 = vmax.f32 %v206_v4, %v207_v8  ;;  %v215_v18 = vmax.f32 %v213_v5, %v214_v9  ;;  %v228_v19 = vrot.slane %v227_v13, 4  ;;  %v975_v20 = vld [vmem:[%s175_s18 + $0x1c] sm:$0xf] }
  0x13   : > { %v222_v21 = vmax.f32 %v220_v10, %v221_v12  ;;  %v234_v22 = vsel %vm198_vm0, %v971_v14, -inf  ;;  %v241_v23 = vsel %vm198_vm0, %v973_v15, -inf  ;;  %v248_v24 = vsel %vm198_vm0, %v975_v20, -inf }
  0x14   : > { %v202_v25 = vrot.slane %v201_v16, 2  ;;  %v209_v26 = vrot.slane %v208_v17, 2  ;;  %v216_v27 = vrot.slane %v215_v18, 2  ;;  %v229_v28 = vmax.f32 %v227_v13, %v228_v19 }
  0x15   : > { %v223_v29 = vrot.slane %v222_v21, 2  ;;  %v235_v30 = vrot.slane %v234_v22, 4  ;;  %v242_v31 = vrot.slane %v241_v23, 4  ;;  %v249_v32 = vrot.slane %v248_v24, 4 }
  0x16   : > { %v203_v33 = vmax.f32 %v201_v16, %v202_v25  ;;  %v210_v34 = vmax.f32 %v208_v17, %v209_v26  ;;  %v217_v35 = vmax.f32 %v215_v18, %v216_v27  ;;  %v230_v36 = vrot.slane %v229_v28, 2 }
  0x17   : > { %v224_v37 = vmax.f32 %v222_v21, %v223_v29  ;;  %v236_v38 = vmax.f32 %v234_v22, %v235_v30  ;;  %v243_v39 = vmax.f32 %v241_v23, %v242_v31  ;;  %v250_v40 = vmax.f32 %v248_v24, %v249_v32 }
  0x18   : > { %v204_v41 = vrot.slane %v203_v33, 1  ;;  %v211_v42 = vrot.slane %v210_v34, 1  ;;  %v218_v43 = vrot.slane %v217_v35, 1  ;;  %v231_v44 = vmax.f32 %v229_v28, %v230_v36 }
  0x19   : > { %v225_v45 = vrot.slane %v224_v37, 1  ;;  %v237_v46 = vrot.slane %v236_v38, 2  ;;  %v244_v47 = vrot.slane %v243_v39, 2  ;;  %v251_v48 = vrot.slane %v250_v40, 2 }
  0x1a   : > { %v205_v49 = vmax.f32 %v203_v33, %v204_v41  ;;  %v212_v50 = vmax.f32 %v210_v34, %v211_v42  ;;  %v219_v51 = vmax.f32 %v217_v35, %v218_v43  ;;  %v232_v52 = vrot.slane %v231_v44, 1 }
  0x1b   : > { %v226_v53 = vmax.f32 %v224_v37, %v225_v45  ;;  %v238_v54 = vmax.f32 %v236_v38, %v237_v46  ;;  %v245_v55 = vmax.f32 %v243_v39, %v244_v47  ;;  %v252_v56 = vmax.f32 %v250_v40, %v251_v48 }
  0x1c   : > { %v255_v57 = vsub.f32 %v951_v0, %v205_v49  ;;  %v256_v58 = vsub.f32 %v953_v1, %v212_v50  ;;  %v257_v59 = vsub.f32 %v955_v2, %v219_v51  ;;  %v233_v60 = vmax.f32 %v231_v44, %v232_v52 }
  0x1d   : > { %v258_v61 = vsub.f32 %v963_v6, %v226_v53  ;;  %v239_v62 = vrot.slane %v238_v54, 1  ;;  %v246_v63 = vrot.slane %v245_v55, 1  ;;  %v253_v3 = vrot.slane %v252_v56, 1 }
  0x1e   : > { %v263_v4 = vmul.f32 1.442695, %v255_v57  ;;  %v265_v5 = vmul.f32 1.442695, %v256_v58  ;;  %v267_v7 = vmul.f32 1.442695, %v257_v59  ;;  %v259_v8 = vsub.f32 %v967_v11, %v233_v60 }
  0x1f   : > { %v269_v9 = vmul.f32 1.442695, %v258_v61  ;;  %v240_v10 = vmax.f32 %v238_v54, %v239_v62  ;;  %v247_v12 = vmax.f32 %v245_v55, %v246_v63  ;;  %v254_v13 = vmax.f32 %v252_v56, %v253_v3 }
  0x20   : > { %875 = vpow2.f32 %v263_v4  ;;  %v271_v0 = vmul.f32 1.442695, %v259_v8 }
  0x21   : > { %877 = vpow2.f32 %v265_v5  ;;  %v260_v1 = vsub.f32 %v971_v14, %v240_v10  ;;  %v261_v2 = vsub.f32 %v973_v15, %v247_v12  ;;  %v262_v6 = vsub.f32 %v975_v20, %v254_v13 }
  0x22   : > { %879 = vpow2.f32 %v267_v7 }
  0x23   : > { %881 = vpow2.f32 %v269_v9  ;;  %v273_v16 = vmul.f32 1.442695, %v260_v1  ;;  %v275_v17 = vmul.f32 1.442695, %v261_v2  ;;  %v277_v18 = vmul.f32 1.442695, %v262_v6 }
  0x24   : > { %883 = vpow2.f32 %v271_v0 }
  0x25   : > { %885 = vpow2.f32 %v273_v16 }
  0x26   : > { %887 = vpow2.f32 %v275_v17  ;;  %v375_v17 = vlaneseq }
  0x27   : > { %889 = vpow2.f32 %v277_v18 }
  0x2d   : > { %v991_v11 = vpop.eup %875 }
  0x2e   : > { %v993_v19 = vpop.eup %877  ;;  %v279_v14 = vsel %vm198_vm0, %v991_v11, 0.0 }
  0x2f   : > { %v997_v21 = vpop.eup %879  ;;  %v280_v15 = vrot.slane %v279_v14, 4  ;;  %v286_v20 = vsel %vm198_vm0, %v993_v19, 0.0 }
  0x30   : > { %v1001_v22 = vpop.eup %881  ;;  %v287_v23 = vrot.slane %v286_v20, 4  ;;  %v293_v24 = vsel %vm198_vm0, %v997_v21, 0.0 }
  0x31   : > { %v1005_v25 = vpop.eup %883  ;;  %v281_v26 = vadd.f32 %v280_v15, %v279_v14  ;;  %v294_v27 = vrot.slane %v293_v24, 4  ;;  %v300_v28 = vsel %vm198_vm0, %v1001_v22, 0.0  ;;  %v376_v15 = vshrl.u32 %v375_v17, 7 }
  0x32   : > { %v1009_v29 = vpop.eup %885  ;;  %v288_v30 = vadd.f32 %v287_v23, %v286_v20  ;;  %v301_v31 = vrot.slane %v300_v28, 4  ;;  %v307_v32 = vsel %vm198_vm0, %v1005_v25, 0.0 }
  0x33   : > { %v1013_v33 = vpop.eup %887  ;;  %v282_v34 = vrot.slane %v281_v26, 2  ;;  %v295_v35 = vadd.f32 %v294_v27, %v293_v24  ;;  %v308_v36 = vrot.slane %v307_v32, 4  ;;  %v314_v37 = vsel %vm198_vm0, %v1009_v29, 0.0 }
  0x34   : > { %v1017_v38 = vpop.eup %889  ;;  %v289_v39 = vrot.slane %v288_v30, 2  ;;  %v302_v40 = vadd.f32 %v301_v31, %v300_v28  ;;  %v315_v41 = vrot.slane %v314_v37, 4  ;;  %v321_v42 = vsel %vm198_vm0, %v1013_v33, 0.0 }
  0x35   : > { %v283_v43 = vadd.f32 %v282_v34, %v281_v26  ;;  %v296_v44 = vrot.slane %v295_v35, 2  ;;  %v309_v45 = vadd.f32 %v308_v36, %v307_v32  ;;  %v322_v46 = vrot.slane %v321_v42, 4  ;;  %v1045_v34 = vld [vmem:[%s1437_s1] sm:$0xff] }
  0x36   : > { %v290_v47 = vadd.f32 %v289_v39, %v288_v30  ;;  %v303_v48 = vrot.slane %v302_v40, 2  ;;  %v316_v49 = vadd.f32 %v315_v41, %v314_v37  ;;  %v328_v50 = vsel %vm198_vm0, %v1017_v38, 0.0  ;;  %v1055_v36 = vld [vmem:[%s1437_s1 + $0x40] sm:$0xff] }
  0x37   : > { %v284_v51 = vrot.slane %v283_v43, 1  ;;  %v297_v52 = vadd.f32 %v296_v44, %v295_v35  ;;  %v310_v53 = vrot.slane %v309_v45, 2  ;;  %v323_v54 = vadd.f32 %v322_v46, %v321_v42  ;;  %v1050_v35 = vld [vmem:[%s1437_s1 + $0x20] sm:$0xff]  ;;  %v1073_v42 = vld [vmem:[%s1437_s1 + $0x8] sm:$0xff] }
  0x38   : > { %v291_v55 = vrot.slane %v290_v47, 1  ;;  %v304_v56 = vadd.f32 %v303_v48, %v302_v40  ;;  %v317_v57 = vrot.slane %v316_v49, 2  ;;  %v329_v58 = vrot.slane %v328_v50, 4  ;;  %v1065_v37 = vld [vmem:[%s1437_s1 + $0x60] sm:$0xff]  ;;  %v1090_v46 = vld [vmem:[%s1437_s1 + $0x48] sm:$0xff] }
  0x39   : > { %v285_v59 = vadd.f32 %v284_v51, %v283_v43  ;;  %v298_v60 = vrot.slane %v297_v52, 1  ;;  %v311_v61 = vadd.f32 %v310_v53, %v309_v45  ;;  %v324_v62 = vrot.slane %v323_v54, 2 }
  0x3a   : > { %v292_v63 = vadd.f32 %v291_v55, %v290_v47  ;;  %v305_v3 = vrot.slane %v304_v56, 1  ;;  %v318_v4 = vadd.f32 %v317_v57, %v316_v49  ;;  %v330_v5 = vadd.f32 %v329_v58, %v328_v50  ;;  %v1095_v47 = vld [vmem:[%s1437_s1 + $0x68] sm:$0xff]  ;;  %v1122_v55 = vld [vmem:[%s1437_s1 + $0x30] sm:$0xff] }
  0x3b   : > { %891 = vrcp.f32 %v285_v59  ;;  %v299_v7 = vadd.f32 %v298_v60, %v297_v52  ;;  %v312_v8 = vrot.slane %v311_v61, 1  ;;  %v325_v9 = vadd.f32 %v324_v62, %v323_v54  ;;  %v1117_v54 = vld [vmem:[%s1437_s1 + $0x10] sm:$0xff]  ;;  %v1146_v62 = vld [vmem:[%s1437_s1 + $0x18] sm:$0xff] }
  0x3c   : > { %893 = vrcp.f32 %v292_v63  ;;  %v306_v10 = vadd.f32 %v305_v3, %v304_v56  ;;  %v319_v12 = vrot.slane %v318_v4, 1  ;;  %v331_v13 = vrot.slane %v330_v5, 2 }
  0x3d   : > { %895 = vrcp.f32 %v299_v7  ;;  %v313_v0 = vadd.f32 %v312_v8, %v311_v61  ;;  %v326_v1 = vrot.slane %v325_v9, 1  ;;  %v1023_v20 = vsub.s32 0, %v376_v15  ;;  %v1141_v61 = vld [vmem:[%s1437_s1 + $0x70] sm:$0xff]  ;;  %v1165_v7 = vld [vmem:[%s1437_s1 + $0x58] sm:$0xff] }
  0x3e   : > { %897 = vrcp.f32 %v306_v10  ;;  %v320_v2 = vadd.f32 %v319_v12, %v318_v4  ;;  %v332_v6 = vadd.f32 %v331_v13, %v330_v5  ;;  %v1025_v23 = vsub.s32 1, %v376_v15  ;;  %v1176_v12 = vld [vmem:[%s1437_s1 + $0x78] sm:$0xff] }
  0x3f   : > { %899 = vrcp.f32 %v313_v0  ;;  %v327_v16 = vadd.f32 %v326_v1, %v325_v9  ;;  %v1027_v24 = vsub.s32 2, %v376_v15  ;;  %v1036_v27 = vsub.s32 3, %v376_v15 }
  0x40   : > { %901 = vrcp.f32 %v320_v2  ;;  %v333_v18 = vrot.slane %v332_v6, 1 }
  0x41   : > { %903 = vrcp.f32 %v327_v16 }
  0x42   : > { %v334_v14 = vadd.f32 %v333_v18, %v332_v6 }
  0x44   : > { %905 = vrcp.f32 %v334_v14 }
  0x48   : > { %v892_v26 = vpop.eup %891 }
  0x49   : > { %v894_v28 = vpop.eup %893  ;;  %v343_v30 = vmul.f32 %v892_v26, %v991_v11 }
  0x4a   : > { %v896_v31 = vpop.eup %895  ;;  %v1040_v32 = vmul.f32 %v894_v28, %v993_v19 }
  0x4b   : > { %v898_v11 = vpop.eup %897  ;;  %351 = vst.msk [vmem:[%s1034_s21] sm:$0xf] %vm198_vm0, %v343_v30  ;;  %v1060_v19 = vmul.f32 %v896_v31, %v997_v21  ;;  %v378_v39 = vrot.slane %v343_v30, %v1023_v20  ;;  %v442_v40 = vrot.slane %v343_v30, %v1025_v23  ;;  %v538_v41 = vrot.slane %v343_v30, %v1027_v24  ;;  %v1078_v21 = vld [vmem:[%s1437_s1 + $0x28] sm:$0xff] }
  0x4c   : > { %v900_v43 = vpop.eup %899  ;;  %352 = vst.msk [vmem:[%s1034_s21 + $0x4] sm:$0xf] %vm198_vm0, %v1040_v32  ;;  %v1084_v44 = vmul.f32 %v898_v11, %v1001_v22  ;;  %v634_v45 = vrot.slane %v343_v30, %v1036_v27  ;;  %v1099_v48 = vrot.slane %v1040_v32, %v1023_v20  ;;  %v1103_v22 = vrot.slane %v1040_v32, %v1025_v23 }
  0x4d   : > { %v902_v49 = vpop.eup %901  ;;  %353 = vst.msk [vmem:[%s1034_s21 + $0x8] sm:$0xf] %vm198_vm0, %v1060_v19  ;;  %v1109_v50 = vmul.f32 %v900_v43, %v1005_v25  ;;  %v407_v51 = vmul.f32 %v378_v39, %v1045_v34  ;;  %v471_v52 = vmul.f32 %v442_v40, %v1050_v35  ;;  %v567_v53 = vmul.f32 %v538_v41, %v1055_v36  ;;  %v1127_v25 = vld [vmem:[%s1437_s1 + $0x50] sm:$0xff] }
  0x4e   : > { %v904_v56 = vpop.eup %903  ;;  %354 = vst.msk [vmem:[%s1034_s21 + $0xc] sm:$0xf] %vm198_vm0, %v1084_v44  ;;  %v1133_v57 = vmul.f32 %v902_v49, %v1009_v29  ;;  %v663_v58 = vmul.f32 %v634_v45, %v1065_v37  ;;  %v408_v59 = vmul.f32 %v378_v39, %v1073_v42  ;;  %v472_v60 = vmul.f32 %v442_v40, %v1078_v21  ;;  %v1151_v29 = vld [vmem:[%s1437_s1 + $0x38] sm:$0xff] }
  0x4f   : > { %355 = vst.msk [vmem:[%s1034_s21 + $0x10] sm:$0xf] %vm198_vm0, %v1109_v50  ;;  %v1158_v63 = vmul.f32 %v904_v56, %v1013_v33  ;;  %v503_v3 = vadd.f32 %v471_v52, %v407_v51  ;;  %v568_v4 = vmul.f32 %v538_v41, %v1090_v46  ;;  %v664_v5 = vmul.f32 %v634_v45, %v1095_v47 }
  0x50   : > { %356 = vst.msk [vmem:[%s1034_s21 + $0x14] sm:$0xf] %vm198_vm0, %v1133_v57  ;;  %v504_v8 = vadd.f32 %v472_v60, %v408_v59  ;;  %v409_v9 = vmul.f32 %v378_v39, %v1117_v54  ;;  %v473_v10 = vmul.f32 %v442_v40, %v1122_v55  ;;  %v569_v33 = vmul.f32 %v538_v41, %v1127_v25 }
  0x51   : > { %v906_v13 = vpop.eup %905  ;;  %357 = vst.msk [vmem:[%s1034_s21 + $0x18] sm:$0xf] %vm198_vm0, %v1158_v63  ;;  %v599_v0 = vadd.f32 %v567_v53, %v503_v3  ;;  %v665_v1 = vmul.f32 %v634_v45, %v1141_v61  ;;  %v410_v2 = vmul.f32 %v378_v39, %v1146_v62  ;;  %v474_v6 = vmul.f32 %v442_v40, %v1151_v29 }
  0x52   : > { %v1190_v16 = vmul.f32 %v906_v13, %v1017_v38  ;;  %v600_v17 = vadd.f32 %v568_v4, %v504_v8  ;;  %v505_v18 = vadd.f32 %v473_v10, %v409_v9  ;;  %v570_v14 = vmul.f32 %v538_v41, %v1165_v7 }
  0x53   : > { %v695_v15 = vadd.f32 %v663_v58, %v599_v0  ;;  %v506_v26 = vadd.f32 %v474_v6, %v410_v2  ;;  %v666_v28 = vmul.f32 %v634_v45, %v1176_v12  ;;  %v411_v30 = vmul.f32 %v1099_v48, %v1045_v34 }
  0x54   : > { %358 = vst.msk [vmem:[%s1034_s21 + $0x1c] sm:$0xf] %vm198_vm0, %v1190_v16  ;;  %v696_v31 = vadd.f32 %v664_v5, %v600_v17  ;;  %v601_v11 = vadd.f32 %v569_v33, %v505_v18  ;;  %v475_v38 = vmul.f32 %v1103_v22, %v1050_v35  ;;  %v542_v39 = vrot.slane %v1040_v32, %v1027_v24 }
  0x55   : > { %728 = vst.msk [vmem:[%s1187_s5] sm:$0xff] %vm727_vm1, %v695_v15  ;;  %v602_v40 = vadd.f32 %v570_v14, %v506_v26  ;;  %v638_v41 = vrot.slane %v1040_v32, %v1036_v27  ;;  %v412_v43 = vmul.f32 %v1099_v48, %v1073_v42  ;;  %v476_v45 = vmul.f32 %v1103_v22, %v1078_v21 }
  0x56   : > { %729 = vst.msk [vmem:[%s1187_s5 + $0x8] sm:$0xff] %vm727_vm1, %v696_v31  ;;  %v697_v49 = vadd.f32 %v665_v1, %v601_v11  ;;  %v507_v51 = vadd.f32 %v475_v38, %v411_v30  ;;  %v571_v52 = vmul.f32 %v542_v39, %v1055_v36  ;;  %v572_v53 = vmul.f32 %v542_v39, %v1090_v46 }
  0x57   : > { %v698_v56 = vadd.f32 %v666_v28, %v602_v40  ;;  %v667_v58 = vmul.f32 %v638_v41, %v1065_v37  ;;  %v508_v59 = vadd.f32 %v476_v45, %v412_v43  ;;  %v668_v32 = vmul.f32 %v638_v41, %v1095_v47 }
  0x58   : > { %730 = vst.msk [vmem:[%s1187_s5 + $0x10] sm:$0xff] %vm727_vm1, %v697_v49  ;;  %v603_v60 = vadd.f32 %v571_v52, %v507_v51  ;;  %v413_v3 = vmul.f32 %v1099_v48, %v1117_v54  ;;  %v477_v4 = vmul.f32 %v1103_v22, %v1122_v55  ;;  %v573_v5 = vmul.f32 %v542_v39, %v1127_v25 }
  0x59   : > { %731 = vst.msk [vmem:[%s1187_s5 + $0x18] sm:$0xff] %vm727_vm1, %v698_v56  ;;  %v604_v8 = vadd.f32 %v572_v53, %v508_v59  ;;  %v669_v9 = vmul.f32 %v638_v41, %v1141_v61  ;;  %v414_v10 = vmul.f32 %v1099_v48, %v1146_v62  ;;  %v478_v33 = vmul.f32 %v1103_v22, %v1151_v29 }
  0x5a   : > { %v699_v13 = vadd.f32 %v667_v58, %v603_v60  ;;  %v509_v0 = vadd.f32 %v477_v4, %v413_v3  ;;  %v574_v1 = vmul.f32 %v542_v39, %v1165_v7  ;;  %v670_v2 = vmul.f32 %v638_v41, %v1176_v12 }
  0x5b   : > { %v700_v6 = vadd.f32 %v668_v32, %v604_v8  ;;  %v510_v17 = vadd.f32 %v478_v33, %v414_v10  ;;  %v386_v18 = vrot.slane %v1060_v19, %v1023_v20  ;;  %v450_v14 = vrot.slane %v1060_v19, %v1025_v23 }
  0x5c   : > { %732 = vst.msk [vmem:[%s1187_s5 + $0x20] sm:$0xff] %vm727_vm1, %v699_v13  ;;  %v605_v48 = vadd.f32 %v573_v5, %v509_v0  ;;  %v546_v22 = vrot.slane %v1060_v19, %v1027_v24  ;;  %v642_v15 = vrot.slane %v1060_v19, %v1036_v27  ;;  %v390_v26 = vrot.slane %v1084_v44, %v1023_v20 }
  0x5d   : > { %733 = vst.msk [vmem:[%s1187_s5 + $0x28] sm:$0xff] %vm727_vm1, %v700_v6  ;;  %v606_v28 = vadd.f32 %v574_v1, %v510_v17  ;;  %v415_v30 = vmul.f32 %v386_v18, %v1045_v34  ;;  %v479_v31 = vmul.f32 %v450_v14, %v1050_v35  ;;  %v416_v11 = vmul.f32 %v386_v18, %v1073_v42 }
  0x5e   : > { %v701_v38 = vadd.f32 %v669_v9, %v605_v48  ;;  %v575_v39 = vmul.f32 %v546_v22, %v1055_v36  ;;  %v671_v40 = vmul.f32 %v642_v15, %v1065_v37  ;;  %v480_v19 = vmul.f32 %v450_v14, %v1078_v21 }
  0x5f   : > { %v702_v41 = vadd.f32 %v670_v2, %v606_v28  ;;  %v511_v43 = vadd.f32 %v479_v31, %v415_v30  ;;  %v576_v45 = vmul.f32 %v546_v22, %v1090_v46  ;;  %v672_v49 = vmul.f32 %v642_v15, %v1095_v47 }
  0x60   : > { %734 = vst.msk [vmem:[%s1187_s5 + $0x30] sm:$0xff] %vm727_vm1, %v701_v38  ;;  %v512_v51 = vadd.f32 %v480_v19, %v416_v11  ;;  %v417_v52 = vmul.f32 %v386_v18, %v1117_v54  ;;  %v481_v53 = vmul.f32 %v450_v14, %v1122_v55  ;;  %v577_v56 = vmul.f32 %v546_v22, %v1127_v25 }
  0x61   : > { %735 = vst.msk [vmem:[%s1187_s5 + $0x38] sm:$0xff] %vm727_vm1, %v702_v41  ;;  %v607_v58 = vadd.f32 %v575_v39, %v511_v43  ;;  %v673_v59 = vmul.f32 %v642_v15, %v1141_v61  ;;  %v418_v32 = vmul.f32 %v386_v18, %v1146_v62  ;;  %v482_v60 = vmul.f32 %v450_v14, %v1151_v29 }
  0x62   : > { %v608_v3 = vadd.f32 %v576_v45, %v512_v51  ;;  %v513_v4 = vadd.f32 %v481_v53, %v417_v52  ;;  %v578_v5 = vmul.f32 %v546_v22, %v1165_v7  ;;  %v674_v8 = vmul.f32 %v642_v15, %v1176_v12 }
  0x63   : > { %v703_v9 = vadd.f32 %v671_v40, %v607_v58  ;;  %v514_v10 = vadd.f32 %v482_v60, %v418_v32  ;;  %v419_v33 = vmul.f32 %v390_v26, %v1045_v34  ;;  %v454_v13 = vrot.slane %v1084_v44, %v1025_v23 }
  0x64   : > { %v704_v0 = vadd.f32 %v672_v49, %v608_v3  ;;  %v609_v1 = vadd.f32 %v577_v56, %v513_v4  ;;  %v550_v2 = vrot.slane %v1084_v44, %v1027_v24  ;;  %v646_v6 = vrot.slane %v1084_v44, %v1036_v27 }
  0x65   : > { %736 = vst.msk [vmem:[%s1187_s5 + $0x40] sm:$0xff] %vm727_vm1, %v703_v9  ;;  %v610_v17 = vadd.f32 %v578_v5, %v514_v10  ;;  %v483_v18 = vmul.f32 %v454_v13, %v1050_v35  ;;  %v420_v14 = vmul.f32 %v390_v26, %v1073_v42  ;;  %v484_v48 = vmul.f32 %v454_v13, %v1078_v21 }
  0x66   : > { %737 = vst.msk [vmem:[%s1187_s5 + $0x48] sm:$0xff] %vm727_vm1, %v704_v0  ;;  %v705_v22 = vadd.f32 %v673_v59, %v609_v1  ;;  %v579_v15 = vmul.f32 %v550_v2, %v1055_v36  ;;  %v675_v28 = vmul.f32 %v646_v6, %v1065_v37  ;;  %v580_v30 = vmul.f32 %v550_v2, %v1090_v46 }
  0x67   : > { %v706_v44 = vadd.f32 %v674_v8, %v610_v17  ;;  %v515_v31 = vadd.f32 %v483_v18, %v419_v33  ;;  %v516_v11 = vadd.f32 %v484_v48, %v420_v14  ;;  %v676_v38 = vmul.f32 %v646_v6, %v1095_v47 }
  0x68   : > { %738 = vst.msk [vmem:[%s1187_s5 + $0x50] sm:$0xff] %vm727_vm1, %v705_v22  ;;  %v421_v39 = vmul.f32 %v390_v26, %v1117_v54  ;;  %v485_v40 = vmul.f32 %v454_v13, %v1122_v55  ;;  %v581_v19 = vmul.f32 %v550_v2, %v1127_v25  ;;  %v677_v41 = vmul.f32 %v646_v6, %v1141_v61 }
  0x69   : > { %739 = vst.msk [vmem:[%s1187_s5 + $0x58] sm:$0xff] %vm727_vm1, %v706_v44  ;;  %v611_v43 = vadd.f32 %v579_v15, %v515_v31  ;;  %v612_v45 = vadd.f32 %v580_v30, %v516_v11  ;;  %v422_v49 = vmul.f32 %v390_v26, %v1146_v62  ;;  %v486_v51 = vmul.f32 %v454_v13, %v1151_v29 }
  0x6a   : > { %v517_v52 = vadd.f32 %v485_v40, %v421_v39  ;;  %v582_v53 = vmul.f32 %v550_v2, %v1165_v7  ;;  %v678_v56 = vmul.f32 %v646_v6, %v1176_v12  ;;  %v394_v58 = vrot.slane %v1109_v50, %v1023_v20 }
  0x6b   : > { %v707_v59 = vadd.f32 %v675_v28, %v611_v43  ;;  %v708_v32 = vadd.f32 %v676_v38, %v612_v45  ;;  %v518_v60 = vadd.f32 %v486_v51, %v422_v49  ;;  %v458_v3 = vrot.slane %v1109_v50, %v1025_v23 }
  0x6c   : > { %v613_v4 = vadd.f32 %v581_v19, %v517_v52  ;;  %v423_v5 = vmul.f32 %v394_v58, %v1045_v34  ;;  %v554_v26 = vrot.slane %v1109_v50, %v1027_v24  ;;  %v650_v8 = vrot.slane %v1109_v50, %v1036_v27 }
  0x6d   : > { %740 = vst.msk [vmem:[%s1187_s5 + $0x60] sm:$0xff] %vm727_vm1, %v707_v59  ;;  %741 = vst.msk [vmem:[%s1187_s5 + $0x68] sm:$0xff] %vm727_vm1, %v708_v32  ;;  %v614_v9 = vadd.f32 %v582_v53, %v518_v60  ;;  %v487_v10 = vmul.f32 %v458_v3, %v1050_v35  ;;  %v424_v33 = vmul.f32 %v394_v58, %v1073_v42 }
  0x6e   : > { %v488_v13 = vmul.f32 %v458_v3, %v1078_v21  ;;  %v709_v0 = vadd.f32 %v677_v41, %v613_v4  ;;  %v583_v1 = vmul.f32 %v554_v26, %v1055_v36  ;;  %v679_v2 = vmul.f32 %v650_v8, %v1065_v37 }
  0x6f   : > { %v584_v6 = vmul.f32 %v554_v26, %v1090_v46  ;;  %v710_v50 = vadd.f32 %v678_v56, %v614_v9  ;;  %v519_v17 = vadd.f32 %v487_v10, %v423_v5  ;;  %v680_v14 = vmul.f32 %v650_v8, %v1095_v47 }
  0x70   : > { %v520_v18 = vadd.f32 %v488_v13, %v424_v33  ;;  %742 = vst.msk [vmem:[%s1187_s5 + $0x70] sm:$0xff] %vm727_vm1, %v709_v0  ;;  %v425_v48 = vmul.f32 %v394_v58, %v1117_v54  ;;  %v489_v22 = vmul.f32 %v458_v3, %v1122_v55  ;;  %v585_v15 = vmul.f32 %v554_v26, %v1127_v25 }
  0x71   : > { %v681_v28 = vmul.f32 %v650_v8, %v1141_v61  ;;  %743 = vst.msk [vmem:[%s1187_s5 + $0x78] sm:$0xff] %vm727_vm1, %v710_v50  ;;  %v615_v30 = vadd.f32 %v583_v1, %v519_v17  ;;  %v426_v31 = vmul.f32 %v394_v58, %v1146_v62  ;;  %v490_v11 = vmul.f32 %v458_v3, %v1151_v29 }
  0x72   : > { %v616_v44 = vadd.f32 %v584_v6, %v520_v18  ;;  %v521_v38 = vadd.f32 %v489_v22, %v425_v48  ;;  %v586_v39 = vmul.f32 %v554_v26, %v1165_v7  ;;  %v682_v40 = vmul.f32 %v650_v8, %v1176_v12 }
  0x73   : > { %v398_v19 = vrot.slane %v1133_v57, %v1023_v20  ;;  %v711_v41 = vadd.f32 %v679_v2, %v615_v30  ;;  %v522_v45 = vadd.f32 %v490_v11, %v426_v31  ;;  %v462_v49 = vrot.slane %v1133_v57, %v1025_v23 }
  0x74   : > { %v712_v43 = vadd.f32 %v680_v14, %v616_v44  ;;  %v617_v51 = vadd.f32 %v585_v15, %v521_v38  ;;  %v558_v53 = vrot.slane %v1133_v57, %v1027_v24  ;;  %v654_v56 = vrot.slane %v1133_v57, %v1036_v27 }
  0x75   : > { %v427_v52 = vmul.f32 %v398_v19, %v1045_v34  ;;  %744 = vst.msk [vmem:[%s1187_s5 + $0x80] sm:$0xff] %vm727_vm1, %v711_v41  ;;  %v618_v58 = vadd.f32 %v586_v39, %v522_v45  ;;  %v491_v59 = vmul.f32 %v462_v49, %v1050_v35  ;;  %v428_v32 = vmul.f32 %v398_v19, %v1073_v42 }
  0x76   : > { %745 = vst.msk [vmem:[%s1187_s5 + $0x88] sm:$0xff] %vm727_vm1, %v712_v43  ;;  %v492_v60 = vmul.f32 %v462_v49, %v1078_v21  ;;  %v713_v3 = vadd.f32 %v681_v28, %v617_v51  ;;  %v587_v4 = vmul.f32 %v558_v53, %v1055_v36  ;;  %v683_v5 = vmul.f32 %v654_v56, %v1065_v37 }
  0x77   : > { %v588_v26 = vmul.f32 %v558_v53, %v1090_v46  ;;  %v714_v57 = vadd.f32 %v682_v40, %v618_v58  ;;  %v523_v8 = vadd.f32 %v491_v59, %v427_v52  ;;  %v684_v10 = vmul.f32 %v654_v56, %v1095_v47 }
  0x78   : > { %v524_v9 = vadd.f32 %v492_v60, %v428_v32  ;;  %746 = vst.msk [vmem:[%s1187_s5 + $0x90] sm:$0xff] %vm727_vm1, %v713_v3  ;;  %v429_v33 = vmul.f32 %v398_v19, %v1117_v54  ;;  %v493_v13 = vmul.f32 %v462_v49, %v1122_v55  ;;  %v589_v0 = vmul.f32 %v558_v53, %v1127_v25 }
  0x79   : > { %v685_v1 = vmul.f32 %v654_v56, %v1141_v61  ;;  %747 = vst.msk [vmem:[%s1187_s5 + $0x98] sm:$0xff] %vm727_vm1, %v714_v57  ;;  %v619_v2 = vadd.f32 %v587_v4, %v523_v8  ;;  %v430_v50 = vmul.f32 %v398_v19, %v1146_v62  ;;  %v494_v17 = vmul.f32 %v462_v49, %v1151_v29 }
  0x7a   : > { %v620_v6 = vadd.f32 %v588_v26, %v524_v9  ;;  %v525_v18 = vadd.f32 %v493_v13, %v429_v33  ;;  %v590_v14 = vmul.f32 %v558_v53, %v1165_v7  ;;  %v686_v48 = vmul.f32 %v654_v56, %v1176_v12 }
  0x7b   : > { %v402_v22 = vrot.slane %v1158_v63, %v1023_v20  ;;  %v715_v15 = vadd.f32 %v683_v5, %v619_v2  ;;  %v526_v30 = vadd.f32 %v494_v17, %v430_v50  ;;  %v466_v44 = vrot.slane %v1158_v63, %v1025_v23 }
  0x7c   : > { %v716_v28 = vadd.f32 %v684_v10, %v620_v6  ;;  %v621_v31 = vadd.f32 %v589_v0, %v525_v18  ;;  %v562_v38 = vrot.slane %v1158_v63, %v1027_v24  ;;  %v658_v39 = vrot.slane %v1158_v63, %v1036_v27 }
  0x7d   : > { %v431_v11 = vmul.f32 %v402_v22, %v1045_v34  ;;  %748 = vst.msk [vmem:[%s1187_s5 + $0xa0] sm:$0xff] %vm727_vm1, %v715_v15  ;;  %v622_v40 = vadd.f32 %v590_v14, %v526_v30  ;;  %v495_v19 = vmul.f32 %v466_v44, %v1050_v35  ;;  %v432_v41 = vmul.f32 %v402_v22, %v1073_v42 }
  0x7e   : > { %749 = vst.msk [vmem:[%s1187_s5 + $0xa8] sm:$0xff] %vm727_vm1, %v716_v28  ;;  %v496_v43 = vmul.f32 %v466_v44, %v1078_v21  ;;  %v717_v45 = vadd.f32 %v685_v1, %v621_v31  ;;  %v591_v49 = vmul.f32 %v562_v38, %v1055_v36  ;;  %v687_v51 = vmul.f32 %v658_v39, %v1065_v37 }
  0x7f   : > { %v592_v52 = vmul.f32 %v562_v38, %v1090_v46  ;;  %v718_v63 = vadd.f32 %v686_v48, %v622_v40  ;;  %v527_v53 = vadd.f32 %v495_v19, %v431_v11  ;;  %v688_v58 = vmul.f32 %v658_v39, %v1095_v47 }
  0x80   : > { %v528_v56 = vadd.f32 %v496_v43, %v432_v41  ;;  %750 = vst.msk [vmem:[%s1187_s5 + $0xb0] sm:$0xff] %vm727_vm1, %v717_v45  ;;  %v433_v59 = vmul.f32 %v402_v22, %v1117_v54  ;;  %v497_v32 = vmul.f32 %v466_v44, %v1122_v55  ;;  %v593_v60 = vmul.f32 %v562_v38, %v1127_v25 }
  0x81   : > { %v689_v3 = vmul.f32 %v658_v39, %v1141_v61  ;;  %751 = vst.msk [vmem:[%s1187_s5 + $0xb8] sm:$0xff] %vm727_vm1, %v718_v63  ;;  %v623_v4 = vadd.f32 %v591_v49, %v527_v53  ;;  %v434_v26 = vmul.f32 %v402_v22, %v1146_v62  ;;  %v498_v57 = vmul.f32 %v466_v44, %v1151_v29 }
  0x82   : > { %v624_v5 = vadd.f32 %v592_v52, %v528_v56  ;;  %v529_v8 = vadd.f32 %v497_v32, %v433_v59  ;;  %v594_v9 = vmul.f32 %v562_v38, %v1165_v7  ;;  %v690_v10 = vmul.f32 %v658_v39, %v1176_v12 }
  0x83   : > { %v406_v33 = vrot.slane %v1190_v16, %v1023_v20  ;;  %v719_v13 = vadd.f32 %v687_v51, %v623_v4  ;;  %v530_v1 = vadd.f32 %v498_v57, %v434_v26  ;;  %v470_v2 = vrot.slane %v1190_v16, %v1025_v23 }
  0x84   : > { %v720_v0 = vadd.f32 %v688_v58, %v624_v5  ;;  %v625_v6 = vadd.f32 %v593_v60, %v529_v8  ;;  %v566_v17 = vrot.slane %v1190_v16, %v1027_v24  ;;  %v662_v18 = vrot.slane %v1190_v16, %v1036_v27 }
  0x85   : > { %v435_v50 = vmul.f32 %v406_v33, %v1045_v34  ;;  %752 = vst.msk [vmem:[%s1187_s5 + $0xc0] sm:$0xff] %vm727_vm1, %v719_v13  ;;  %v626_v20 = vadd.f32 %v594_v9, %v530_v1  ;;  %v499_v14 = vmul.f32 %v470_v2, %v1050_v35  ;;  %v436_v23 = vmul.f32 %v406_v33, %v1073_v42 }
  0x86   : > { %753 = vst.msk [vmem:[%s1187_s5 + $0xc8] sm:$0xff] %vm727_vm1, %v720_v0  ;;  %v500_v48 = vmul.f32 %v470_v2, %v1078_v21  ;;  %v721_v34 = vadd.f32 %v689_v3, %v625_v6  ;;  %v595_v22 = vmul.f32 %v566_v17, %v1055_v36  ;;  %v691_v24 = vmul.f32 %v662_v18, %v1065_v37 }
  0x87   : > { %v596_v15 = vmul.f32 %v566_v17, %v1090_v46  ;;  %v722_v27 = vadd.f32 %v690_v10, %v626_v20  ;;  %v531_v16 = vadd.f32 %v499_v14, %v435_v50  ;;  %v692_v30 = vmul.f32 %v662_v18, %v1095_v47 }
  0x88   : > { %v532_v28 = vadd.f32 %v500_v48, %v436_v23  ;;  %754 = vst.msk [vmem:[%s1187_s5 + $0xd0] sm:$0xff] %vm727_vm1, %v721_v34  ;;  %v437_v35 = vmul.f32 %v406_v33, %v1117_v54  ;;  %v501_v42 = vmul.f32 %v470_v2, %v1122_v55  ;;  %v597_v21 = vmul.f32 %v566_v17, %v1127_v25 }
  0x89   : > { %755 = vst.msk [vmem:[%s1187_s5 + $0xd8] sm:$0xff] %vm727_vm1, %v722_v27  ;;  %v627_v36 = vadd.f32 %v595_v22, %v531_v16  ;;  %v438_v46 = vmul.f32 %v406_v33, %v1146_v62  ;;  %v502_v47 = vmul.f32 %v470_v2, %v1151_v29  ;;  %v693_v31 = vmul.f32 %v662_v18, %v1141_v61 }
  0x8a   : > { %v628_v37 = vadd.f32 %v596_v15, %v532_v28  ;;  %v533_v44 = vadd.f32 %v501_v42, %v437_v35  ;;  %v598_v54 = vmul.f32 %v566_v17, %v1165_v7  ;;  %v694_v25 = vmul.f32 %v662_v18, %v1176_v12 }
  0x8b   : > { %v723_v11 = vadd.f32 %v691_v24, %v627_v36  ;;  %v534_v38 = vadd.f32 %v502_v47, %v438_v46 }
  0x8c   : > { %v724_v55 = vadd.f32 %v692_v30, %v628_v37  ;;  %v629_v39 = vadd.f32 %v597_v21, %v533_v44 }
  0x8d   : > { %756 = vst.msk [vmem:[%s1187_s5 + $0xe0] sm:$0xff] %vm727_vm1, %v723_v11  ;;  %v630_v40 = vadd.f32 %v598_v54, %v534_v38 }
  0x8e   : > { %757 = vst.msk [vmem:[%s1187_s5 + $0xe8] sm:$0xff] %vm727_vm1, %v724_v55  ;;  %v725_v62 = vadd.f32 %v693_v31, %v629_v39 }
  0x8f   : > { %v726_v19 = vadd.f32 %v694_v25, %v630_v40 }
  0x90   : > { %758 = vst.msk [vmem:[%s1187_s5 + $0xf0] sm:$0xff] %vm727_vm1, %v725_v62 }
  0x91   : > { %759 = vst.msk [vmem:[%s1187_s5 + $0xf8] sm:$0xff] %vm727_vm1, %v726_v19 }
  0x92 PF: > { %s14_s12 = sadd.s32 1, %s913_s12  }
  0x93   : > { %p11_p4 = scmp.ge.s32.totalorder %s14_s12, 4  }
  0x95   :  { %13 = sbr.rel (!%p11_p4) target bundleno = 1 (0x1), region = 70 }

</bundles_post_ra>
